<compile_context>
chip_gen: v7x
topology: tpu7x:2x2x1
jax: 0.10.0
libtpu: 0.0.40
codegen_flags: <defaults>
</compile_context>

<pallas_src>
import jax
import jax.numpy as jnp
from jax.experimental import pallas as pl
from jax.experimental.pallas import tpu as pltpu


def _make_mlp_kernel(n_layers, compute_dtype):
    """Build a fused MLP kernel for a fixed number of hidden layers."""

    def kernel(*refs):
        # refs = (x, shift_inv_scale, W1, b1, ..., Wn, bn, Wout, bout, out)
        x_ref, ss_ref = refs[0], refs[1]
        o_ref = refs[-1]

        # Input normalization: (x - shift) * inv_scale, all in f32 (VPU).
        h = (x_ref[...] - ss_ref[0:1, :]) * ss_ref[1:2, :]

        idx = 2
        for _ in range(n_layers):
            w_ref, b_ref = refs[idx], refs[idx + 1]
            idx += 2
            acc = jnp.dot(h.astype(compute_dtype), w_ref[...],
                          preferred_element_type=jnp.float32)
            # bias + ReLU epilogue stays in f32 (no bf16 VPU on v5e).
            h = jnp.maximum(acc + b_ref[...], 0.0)

        wo_ref, bo_ref = refs[idx], refs[idx + 1]
        out = jnp.dot(h.astype(compute_dtype), wo_ref[...],
                      preferred_element_type=jnp.float32) + bo_ref[...]
        o_ref[...] = out.astype(o_ref.dtype)

    return kernel


def _pick_batch_tile(B, requested):
    """Large, 8-aligned batch tile; prefer >= 2 grid steps for megacore."""
    if requested is not None:
        return min(requested, B)
    if B <= 8:
        return B                       # full-extent block (no 8-divisibility needed)
    if B >= 256:
        return 128
    # B in (8, 256): split in two so both TensorCores get work, 8-aligned.
    tb = max(8, (B // 2 // 8) * 8)
    return tb


def mlp_forward(x, shift, scale, hidden_params, out_params, *,
                compute_dtype=jnp.bfloat16, batch_tile=None,
                vmem_cap_bytes=56 * 1024 * 1024):
    """Run the fused MLP Pallas kernel.

    x:             (B, in_dim) float32
    shift, scale:  (in_dim,)   float32
    hidden_params: list of (W, b) with W: (fan_in, n_units), b: (n_units,)
    out_params:    (W_out, b_out) with W_out: (n_units, out_dim), b_out: (out_dim,)
    """
    B, in_dim = x.shape
    n_layers = len(hidden_params)
    w_out, b_out = out_params
    out_dim = w_out.shape[1]

    # Lane-dense output: pad out_dim up to a multiple of 128, slice afterwards.
    out_pad = ((out_dim + 127) // 128) * 128 if out_dim % 128 else out_dim
    if out_pad != out_dim:
        w_out = jnp.pad(w_out, ((0, 0), (0, out_pad - out_dim)))
        b_out = jnp.pad(b_out, (0, out_pad - out_dim))

    # Precompute 1/scale once (multiply in-kernel, not divide) and fuse shift +
    # inv_scale into a single replicated (2, in_dim) operand.
    inv_scale = (1.0 / scale).astype(jnp.float32)
    shift_inv_scale = jnp.stack([shift.astype(jnp.float32), inv_scale], axis=0)

    tb = _pick_batch_tile(B, batch_tile)
    grid = (pl.cdiv(B, tb),)

    def const_spec(shape):
        # Constant-index blocks (weights / biases / shift-scale).
        return pl.BlockSpec(shape, lambda i: (0,) * len(shape))

    flat_params = [shift_inv_scale]
    in_specs = [
        pl.BlockSpec((tb, in_dim), lambda i: (i, 0)),   # x: tiled over batch
        const_spec((2, in_dim)),                        # shift / inv_scale
    ]
    for (w, b) in hidden_params:
        fi, fo = w.shape
        flat_params.append(w.astype(compute_dtype))
        in_specs.append(const_spec((fi, fo)))
        flat_params.append(b.reshape(1, fo).astype(jnp.float32))
        in_specs.append(const_spec((1, fo)))
    fi, fo = w_out.shape
    flat_params.append(w_out.astype(compute_dtype))
    in_specs.append(const_spec((fi, fo)))
    flat_params.append(b_out.reshape(1, fo).astype(jnp.float32))
    in_specs.append(const_spec((1, fo)))

    out_spec = pl.BlockSpec((tb, out_pad), lambda i: (i, 0))

    # Rough VMEM estimate (double-buffered blocks + live activations) -> limit.
    pbytes = jnp.dtype(compute_dtype).itemsize
    layer_shapes = [(w.shape[0], w.shape[1]) for (w, _) in hidden_params]
    layer_shapes.append((w_out.shape[0], out_pad))
    est = 2 * tb * in_dim * 4 + 2 * tb * out_pad * 4 + 2 * 2 * in_dim * 4
    for lfi, lfo in layer_shapes:
        est += 2 * (lfi * lfo * pbytes + lfo * 4)
    max_w = max([in_dim] + [lfo for _, lfo in layer_shapes])
    est += 4 * tb * max_w * 4
    vmem_limit = int(min(vmem_cap_bytes, max(32 * 1024 * 1024, 2 * est)))

    kernel = _make_mlp_kernel(n_layers, compute_dtype)

    out = pl.pallas_call(
        kernel,
        out_shape=jax.ShapeDtypeStruct((B, out_pad), jnp.float32),
        grid_spec=pltpu.PrefetchScalarGridSpec(
            num_scalar_prefetch=0,
            grid=grid,
            in_specs=in_specs,
            out_specs=out_spec,
        ),
        compiler_params=pltpu.CompilerParams(
            dimension_semantics=("parallel",),
            vmem_limit_bytes=vmem_limit,
        ),
    )(x, *flat_params)

    if out_pad != out_dim:
        out = out[:, :out_dim]
    return out


def init_params(key, in_dim, out_dim, n_layers, n_units):
    """Deterministic init matching the PyTorch module's __init__ (shapes-wise)."""
    shift = jnp.zeros((in_dim,), jnp.float32)
    scale = jnp.ones((in_dim,), jnp.float32)

    hidden = []
    prev = in_dim
    for _ in range(n_layers):
        key, kw, kb = jax.random.split(key, 3)
        bound_w = jnp.sqrt(6.0 / prev)              # kaiming_uniform_, relu gain
        w = jax.random.uniform(kw, (prev, n_units), jnp.float32, -bound_w, bound_w)
        bound_b = 1.0 / jnp.sqrt(prev)              # nn.Linear default bias init
        b = jax.random.uniform(kb, (n_units,), jnp.float32, -bound_b, bound_b)
        hidden.append((w, b))
        prev = n_units

    key, kw, kb = jax.random.split(key, 3)
    w_out = jax.random.normal(kw, (prev, out_dim), jnp.float32) / jnp.sqrt(prev)
    bound_b = 1.0 / jnp.sqrt(prev)
    b_out = jax.random.uniform(kb, (out_dim,), jnp.float32, -bound_b, bound_b)

    return shift, scale, hidden, (w_out, b_out)


def mlp_reference(x, shift, scale, hidden_params, out_params,
                  compute_dtype=jnp.float32):
    """Plain-JAX reference mirroring the kernel's dtype policy."""
    inv_scale = 1.0 / scale
    h = (x - shift[None, :]) * inv_scale[None, :]
    for (w, b) in hidden_params:
        acc = jnp.dot(h.astype(compute_dtype), w.astype(compute_dtype),
                      preferred_element_type=jnp.float32)
        h = jnp.maximum(acc + b[None, :], 0.0)
    w_out, b_out = out_params
    return jnp.dot(h.astype(compute_dtype), w_out.astype(compute_dtype),
                   preferred_element_type=jnp.float32) + b_out[None, :]


if __name__ == "__main__":
    # Small shapes consistent with the module; batch large enough that the
    # 1-D batch grid still has 2 steps (tile = 64 rows).
    batch, in_dim, out_dim, n_layers, n_units = 128, 32, 16, 2, 64
    dropout = 0.0  # inference path (identity)

    key = jax.random.PRNGKey(0)
    key, kx, kp = jax.random.split(key, 3)
    x = jax.random.normal(kx, (batch, in_dim), jnp.float32)

    shift, scale, hidden_params, out_params = init_params(
        kp, in_dim, out_dim, n_layers, n_units
    )
    # Give shift/scale non-trivial values (module allows passing them in).
    shift = 0.1 * jnp.arange(in_dim, dtype=jnp.float32)
    scale = 1.0 + 0.05 * jnp.arange(in_dim, dtype=jnp.float32)

    # Exact-semantics (f32) run and MXU-friendly (bf16) run.
    out_f32 = jax.block_until_ready(
        mlp_forward(x, shift, scale, hidden_params, out_params,
                    compute_dtype=jnp.float32))
    out_bf16 = jax.block_until_ready(
        mlp_forward(x, shift, scale, hidden_params, out_params,
                    compute_dtype=jnp.bfloat16))

    ref_f32 = mlp_reference(x, shift, scale, hidden_params, out_params,
                            compute_dtype=jnp.float32)
    ref_bf16 = mlp_reference(x, shift, scale, hidden_params, out_params,
                             compute_dtype=jnp.bfloat16)

    assert out_f32.shape == (batch, out_dim)
    assert jnp.allclose(out_f32, ref_f32, atol=1e-4, rtol=1e-4), \
        "f32 kernel mismatch vs reference"
    assert out_bf16.shape == (batch, out_dim)
    assert jnp.allclose(out_bf16, ref_bf16, atol=5e-2, rtol=5e-2), \
        "bf16 kernel mismatch vs reference"

    print("KERNEL_OK")
</pallas_src>

<mosaic_0001>
module attributes {stable_mosaic.version = 11 : i64} {
  func.func @kernel(%arg0: i32, %arg1: memref<64x32xf32, #tpu.memory_space<vmem>>, %arg2: memref<2x32xf32, #tpu.memory_space<vmem>>, %arg3: memref<32x64xf32, #tpu.memory_space<vmem>>, %arg4: memref<1x64xf32, #tpu.memory_space<vmem>>, %arg5: memref<64x64xf32, #tpu.memory_space<vmem>>, %arg6: memref<1x64xf32, #tpu.memory_space<vmem>>, %arg7: memref<64x128xf32, #tpu.memory_space<vmem>>, %arg8: memref<1x128xf32, #tpu.memory_space<vmem>>, %arg9: memref<64x128xf32, #tpu.memory_space<vmem>>) attributes {dimension_semantics = [#tpu.dimension_semantics<parallel>], iteration_bounds = array<i64: 2>, scalar_prefetch = 0 : i64, scratch_operands = 0 : i64, tpu.core_type = #tpu.core_type<tc>, window_params = [{transform_indices = @transform_0, window_bounds = array<i64: 64, 32>}, {pipeline_mode = #tpu.pipeline_mode<synchronous>, transform_indices = @transform_1, window_bounds = array<i64: 2, 32>}, {pipeline_mode = #tpu.pipeline_mode<synchronous>, transform_indices = @transform_2, window_bounds = array<i64: 32, 64>}, {pipeline_mode = #tpu.pipeline_mode<synchronous>, transform_indices = @transform_3, window_bounds = array<i64: 1, 64>}, {pipeline_mode = #tpu.pipeline_mode<synchronous>, transform_indices = @transform_4, window_bounds = array<i64: 64, 64>}, {pipeline_mode = #tpu.pipeline_mode<synchronous>, transform_indices = @transform_5, window_bounds = array<i64: 1, 64>}, {pipeline_mode = #tpu.pipeline_mode<synchronous>, transform_indices = @transform_6, window_bounds = array<i64: 64, 128>}, {pipeline_mode = #tpu.pipeline_mode<synchronous>, transform_indices = @transform_7, window_bounds = array<i64: 1, 128>}, {transform_indices = @transform_8, window_bounds = array<i64: 64, 128>}]} {
    %c0 = arith.constant 0 : index
    %c0_0 = arith.constant 0 : index
    %0 = vector.load %arg1[%c0, %c0_0] : memref<64x32xf32, #tpu.memory_space<vmem>>, vector<64x32xf32>
    %c0_1 = arith.constant 0 : index
    %c0_2 = arith.constant 0 : index
    %1 = vector.load %arg2[%c0_1, %c0_2] : memref<2x32xf32, #tpu.memory_space<vmem>>, vector<1x32xf32>
    %2 = vector.broadcast %1 : vector<1x32xf32> to vector<64x32xf32>
    %3 = arith.subf %0, %2 : vector<64x32xf32>
    %c1 = arith.constant 1 : index
    %c0_3 = arith.constant 0 : index
    %4 = vector.load %arg2[%c1, %c0_3] : memref<2x32xf32, #tpu.memory_space<vmem>>, vector<1x32xf32>
    %5 = vector.broadcast %4 : vector<1x32xf32> to vector<64x32xf32>
    %6 = arith.mulf %3, %5 : vector<64x32xf32>
    %c0_4 = arith.constant 0 : index
    %c0_5 = arith.constant 0 : index
    %7 = vector.load %arg3[%c0_4, %c0_5] : memref<32x64xf32, #tpu.memory_space<vmem>>, vector<32x64xf32>
    %cst = arith.constant dense<0.000000e+00> : vector<64x64xf32>
    %8 = tpu.matmul %6, %7, %cst {dimension_numbers = #tpu.dot_dimension_numbers<[1], [0], [0], [1], [0, 0, 1, 1], [], []>} : vector<64x32xf32>, vector<32x64xf32>, vector<64x64xf32> -> vector<64x64xf32>
    %c0_6 = arith.constant 0 : index
    %c0_7 = arith.constant 0 : index
    %9 = vector.load %arg4[%c0_6, %c0_7] : memref<1x64xf32, #tpu.memory_space<vmem>>, vector<1x64xf32>
    %10 = vector.broadcast %9 : vector<1x64xf32> to vector<64x64xf32>
    %11 = arith.addf %8, %10 : vector<64x64xf32>
    %cst_8 = arith.constant 0.000000e+00 : f32
    %12 = vector.broadcast %cst_8 : f32 to vector<64x64xf32>
    %13 = arith.maximumf %11, %12 : vector<64x64xf32>
    %c0_9 = arith.constant 0 : index
    %c0_10 = arith.constant 0 : index
    %14 = vector.load %arg5[%c0_9, %c0_10] : memref<64x64xf32, #tpu.memory_space<vmem>>, vector<64x64xf32>
    %cst_11 = arith.constant dense<0.000000e+00> : vector<64x64xf32>
    %15 = tpu.matmul %13, %14, %cst_11 {dimension_numbers = #tpu.dot_dimension_numbers<[1], [0], [0], [1], [0, 0, 1, 1], [], []>} : vector<64x64xf32>, vector<64x64xf32>, vector<64x64xf32> -> vector<64x64xf32>
    %c0_12 = arith.constant 0 : index
    %c0_13 = arith.constant 0 : index
    %16 = vector.load %arg6[%c0_12, %c0_13] : memref<1x64xf32, #tpu.memory_space<vmem>>, vector<1x64xf32>
    %17 = vector.broadcast %16 : vector<1x64xf32> to vector<64x64xf32>
    %18 = arith.addf %15, %17 : vector<64x64xf32>
    %cst_14 = arith.constant 0.000000e+00 : f32
    %19 = vector.broadcast %cst_14 : f32 to vector<64x64xf32>
    %20 = arith.maximumf %18, %19 : vector<64x64xf32>
    %c0_15 = arith.constant 0 : index
    %c0_16 = arith.constant 0 : index
    %21 = vector.load %arg7[%c0_15, %c0_16] : memref<64x128xf32, #tpu.memory_space<vmem>>, vector<64x128xf32>
    %cst_17 = arith.constant dense<0.000000e+00> : vector<64x128xf32>
    %22 = tpu.matmul %20, %21, %cst_17 {dimension_numbers = #tpu.dot_dimension_numbers<[1], [0], [0], [1], [0, 0, 1, 1], [], []>} : vector<64x64xf32>, vector<64x128xf32>, vector<64x128xf32> -> vector<64x128xf32>
    %c0_18 = arith.constant 0 : index
    %c0_19 = arith.constant 0 : index
    %23 = vector.load %arg8[%c0_18, %c0_19] : memref<1x128xf32, #tpu.memory_space<vmem>>, vector<1x128xf32>
    %24 = vector.broadcast %23 : vector<1x128xf32> to vector<64x128xf32>
    %25 = arith.addf %22, %24 : vector<64x128xf32>
    %c0_20 = arith.constant 0 : index
    %c0_21 = arith.constant 0 : index
    %26 = vector.load %arg9[%c0_20, %c0_21] : memref<64x128xf32, #tpu.memory_space<vmem>>, vector<64x128xf32>
    tpu.vector_store %arg9[%c0_20, %c0_21], %25 {strides = array<i32>} : memref<64x128xf32, #tpu.memory_space<vmem>>, vector<64x128xf32>,
    return
  }
  func.func @transform_0(%arg0: i32) -> (i32, i32) {
    %c0_i32 = arith.constant 0 : i32
    %c0_i32_0 = arith.constant 0 : i32
    return %arg0, %c0_i32 : i32, i32
  }
  func.func @transform_1(%arg0: i32) -> (i32, i32) {
    %c0_i32 = arith.constant 0 : i32
    %c0_i32_0 = arith.constant 0 : i32
    %c0_i32_1 = arith.constant 0 : i32
    return %c0_i32, %c0_i32_0 : i32, i32
  }
  func.func @transform_2(%arg0: i32) -> (i32, i32) {
    %c0_i32 = arith.constant 0 : i32
    %c0_i32_0 = arith.constant 0 : i32
    %c0_i32_1 = arith.constant 0 : i32
    return %c0_i32, %c0_i32_0 : i32, i32
  }
  func.func @transform_3(%arg0: i32) -> (i32, i32) {
    %c0_i32 = arith.constant 0 : i32
    %c0_i32_0 = arith.constant 0 : i32
    %c0_i32_1 = arith.constant 0 : i32
    return %c0_i32, %c0_i32_0 : i32, i32
  }
  func.func @transform_4(%arg0: i32) -> (i32, i32) {
    %c0_i32 = arith.constant 0 : i32
    %c0_i32_0 = arith.constant 0 : i32
    %c0_i32_1 = arith.constant 0 : i32
    return %c0_i32, %c0_i32_0 : i32, i32
  }
  func.func @transform_5(%arg0: i32) -> (i32, i32) {
    %c0_i32 = arith.constant 0 : i32
    %c0_i32_0 = arith.constant 0 : i32
    %c0_i32_1 = arith.constant 0 : i32
    return %c0_i32, %c0_i32_0 : i32, i32
  }
  func.func @transform_6(%arg0: i32) -> (i32, i32) {
    %c0_i32 = arith.constant 0 : i32
    %c0_i32_0 = arith.constant 0 : i32
    %c0_i32_1 = arith.constant 0 : i32
    return %c0_i32, %c0_i32_0 : i32, i32
  }
  func.func @transform_7(%arg0: i32) -> (i32, i32) {
    %c0_i32 = arith.constant 0 : i32
    %c0_i32_0 = arith.constant 0 : i32
    %c0_i32_1 = arith.constant 0 : i32
    return %c0_i32, %c0_i32_0 : i32, i32
  }
  func.func @transform_8(%arg0: i32) -> (i32, i32) {
    %c0_i32 = arith.constant 0 : i32
    %c0_i32_0 = arith.constant 0 : i32
    return %arg0, %c0_i32 : i32, i32
  }
}

</mosaic_0001>

<bundles_post_ra>
// kernel: tpu_custom_call.1
= control target key start
LH: loop header
LB: loop body
LE: loop exit
PB: predicated region body
PF: predicated region fallthrough
CT: control target
= control target key end

     0   :  { %13 = vsyncpa [#allocation3], 0  ;;  %s1449_s0 = inlined_call_operand.vmem [shape: f32[128,32], index: 0, kind: input, shape index: {}]   ;;  %s1450_s1 = inlined_call_operand.vmem [shape: f32[2,32], index: 1, kind: input, shape index: {}]   ;;  %s1451_s2 = inlined_call_operand.vmem [shape: f32[32,64], index: 2, kind: input, shape index: {}]   ;;  %s1452_s3 = inlined_call_operand.vmem [shape: f32[1,64], index: 3, kind: input, shape index: {}]   ;;  %s1453_s4 = inlined_call_operand.vmem [shape: f32[64,64], index: 4, kind: input, shape index: {}]   ;;  %s1454_s5 = inlined_call_operand.vmem [shape: f32[1,64], index: 5, kind: input, shape index: {}]   ;;  %s1455_s6 = inlined_call_operand.vmem [shape: f32[64,128], index: 6, kind: input, shape index: {}]   ;;  %s1456_s7 = inlined_call_operand.vmem [shape: f32[1,128], index: 7, kind: input, shape index: {}]   ;;  %s1457_s8 = inlined_call_operand.hbm [shape: f32[128,128], index: 8, kind: output, shape index: {}]  }
   0x1   :  { %15 = vsyncpa [#allocation3 + $0x1], 0  ;;  %s1234_s27 = smov 0   ;;  %s1236_s28 = smov 0  }
   0x2   :  { %s1238_s29 = smov 0   ;;  %s1240_s30 = smov 0  }
   0x3 LB: > { %s1255_s9 = sadd.s32 4294967295, %s1184_s30   ;;  %s871_s10 = sadd.s32 4294967294, %s1184_s30   ;;  %s1184_s30 = sphi %s1240_s30, %s1463_s30   ;;  %s1180_s29 = sphi %s1238_s29, %s1462_s29   ;;  %s1176_s28 = sphi %s1236_s28, %s1461_s28   ;;  %s1172_s27 = sphi %s1234_s27, %s1460_s27  }
   0x4   : > { %s1259_s11 = sadd.s32 1, %s1184_s30   ;;  %s201_s12 = sadd.s32 1, %s1180_s29 }
   0x5   : > { %s198_s13 = ssub.s32 %s1184_s30, %s1259_s11  ;;  %p211_p0 = scmp.ne.s32.totalorder %s1180_s29, %s1176_s28 }
   0x6   : > { %p199_p1 = scmp.eq.s32.totalorder %s198_s13, 0  ;;  %p212_p2 = scmp.eq.s32.totalorder %s1255_s9, 1 }
   0x7   : > { %p217_p3 = scmp.ne.s32.totalorder %s1176_s28, %s1172_s27  ;;  %p218_p4 = scmp.eq.s32.totalorder %s871_s10, 1 }
   0x8   : > { %s1270_s14 = scalar_select %p199_p1, %s1180_s29, %s201_s12  }
   0x9   : > { %p1272_p5 = por %p212_p2, %p211_p0  ;;  %p1276_p6 = por %p218_p4, %p217_p3 }
   0xa   : > { %p874_p7 = scmp.ge.s32.totalorder %s1184_s30, 1  ;;  %p266_p8 = scmp.lt.s32.totalorder %s1184_s30, 3 }
   0xc   : > { %p267_p9 = pnand %p874_p7, %p266_p8 }
   0xd   : > { %v341_v0 = vld [vmem:[%s1451_s2] sm:$0xff] (!%p267_p9)  ;;  %v342_v1 = vld [vmem:[%s1451_s2 + $0x8] sm:$0xff] (!%p267_p9)  ;;  %v343_v2 = vld [vmem:[%s1451_s2 + $0x10] sm:$0xff] (!%p267_p9)  ;;  %s876_s23 = sshll.u32 (!%p267_p9), %s1255_s9, 3  ;;  %vm352_vm0 = vcmask (!%p267_p9), 261120   ;;  %vm505_vm1 = vcmask (!%p267_p9), 523264  }
   0xe   : > { %270 = sbr.rel (%p267_p9) target bundleno = 708 (0x2c4), region = 52  ;;  %v1033_v3 = vpack.c.bf16 (!%p267_p9), %v342_v1, %v341_v0  ;;  %v344_v4 = vld [vmem:[%s1451_s2 + $0x18] sm:$0xff] (!%p267_p9)  ;;  %p301_p10 = scmp.lt.s32.totalorder (!%p267_p9), %s876_s23, 15  ;;  %v490_v6 = vld [vmem:[%s1453_s4] sm:$0xff] (!%p267_p9)  ;;  %v491_v7 = vld [vmem:[%s1453_s4 + $0x8] sm:$0xff] (!%p267_p9) }
   0xf   : > { %v1037_v5 = vpack.c.bf16 (!%p267_p9), %v344_v4, %v343_v2  ;;  %v492_v8 = vld [vmem:[%s1453_s4 + $0x10] sm:$0xff] (!%p267_p9)  ;;  %v1041_v9 = vpack.c.bf16 (!%p267_p9), %v491_v7, %v490_v6  ;;  %v493_v10 = vld [vmem:[%s1453_s4 + $0x18] sm:$0xff] (!%p267_p9)  ;;  %v494_v12 = vld [vmem:[%s1453_s4 + $0x20] sm:$0xff] (!%p267_p9)  ;;  %s297_s19 = sand.u32 (!%p267_p9), 1, %s1176_s28   ;;  %s912_s24 = sshll.u32 (!%p267_p9), %s1255_s9, 10 }
  0x10   : > { %1034 = vmatprep.subr.bf16.mxu0 (!%p267_p9), %v1033_v3  ;;  %v1045_v11 = vpack.c.bf16 (!%p267_p9), %v493_v10, %v492_v8  ;;  %v495_v13 = vld [vmem:[%s1453_s4 + $0x28] sm:$0xff] (!%p267_p9)  ;;  %v878_v14 = vld [vmem:[%s1450_s1] ss:$0 sm:$0xff] (!%p267_p9)  ;;  %v879_v15 = vld [vmem:[%s1450_s1 + $0x1] ss:$0 sm:$0xff] (!%p267_p9)  ;;  %s875_s20 = sshll.u32 (!%p267_p9), %s297_s19, 6  ;;  %s1402_s12 = scalar_lea.hbm (!%p267_p9), %s1457_s8, %s912_s24 }
  0x11   : > { %1036 = vmatpush3.bf16.msra.mxu0 (!%p267_p9), %v1033_v3  ;;  %1042 = vmatprep.subr.bf16.mxu1 (!%p267_p9), %v1041_v9  ;;  %v1049_v19 = vpack.c.bf16 (!%p267_p9), %v495_v13, %v494_v12  ;;  %v496_v41 = vld [vmem:[%s1453_s4 + $0x30] sm:$0xff] (!%p267_p9)  ;;  %v497_v42 = vld [vmem:[%s1453_s4 + $0x38] sm:$0xff] (!%p267_p9)  ;;  %v643_v44 = vld [vmem:[%s1455_s6] sm:$0xff] (!%p267_p9)  ;;  %s299_s22 = scalar_lea.vmem (!%p267_p9), [#allocation2], %s875_s20  ;;  %s1408_s9 = scalar_lea.sflag (!%p267_p9), [#allocation3], %s297_s19 }
  0x12   : > { %1038 = vmatprep.subr.bf16.mxu0 (!%p267_p9), %v1037_v5  ;;  %1044 = vmatpush3.bf16.msra.mxu1 (!%p267_p9), %v1041_v9  ;;  %v1053_v43 = vpack.c.bf16 (!%p267_p9), %v497_v42, %v496_v41  ;;  %v644_v45 = vld [vmem:[%s1455_s6 + $0x8] sm:$0xff] (!%p267_p9)  ;;  %v645_v46 = vld [vmem:[%s1455_s6 + $0x10] sm:$0xff] (!%p267_p9)  ;;  %v646_v48 = vld [vmem:[%s1455_s6 + $0x18] sm:$0xff] (!%p267_p9)  ;;  %s809_s25 = sshll.u32 (!%p267_p9), %s299_s22, 4  ;;  %s1186_s17 = smov (!%p267_p9), [#allocation2]   ;;  %s1404_s25 = int_to_ptr.vmem [resolvable:$true] %s809_s25 }
  0x13   : > { %1046 = vmatprep.subr.bf16.mxu1 (!%p267_p9), %v1045_v11  ;;  %v1057_v47 = vpack.c.bf16 (!%p267_p9), %v644_v45, %v643_v44  ;;  %v1061_v49 = vpack.c.bf16 (!%p267_p9), %v646_v48, %v645_v46  ;;  %v647_v50 = vld [vmem:[%s1455_s6 + $0x20] sm:$0xff] (!%p267_p9)  ;;  %v648_v51 = vld [vmem:[%s1455_s6 + $0x28] sm:$0xff] (!%p267_p9)  ;;  %s1122_s13 = scalar_lea.vmem (!%p267_p9), %s1404_s25, 1024 }
  0x14   : > { %v1065_v52 = vpack.c.bf16 (!%p267_p9), %v648_v51, %v647_v50  ;;  %v880_v53 = vld [vmem:[%s1452_s3] ss:$0 sm:$0xff] (!%p267_p9)  ;;  %p1123_p11 = scmp.ne.s32.totalorder (!%p267_p9), %s1404_s25, %s1122_s13 }
  0x15   : > { %s1465_s23 = smov (!%p301_p10, %s876_s23), 15  ;;  %1040 = vmatpush3.bf16.msra.mxu0 %v1037_v5  ;;  %v898_v42 = vld [vmem:[%s1456_s7] ss:$0 sm:$0xff] }
  0x16   : > { %s877_s26 = sshll.u32 %s1465_s23, 3  ;;  %1048 = vmatpush3.bf16.msra.mxu1 %v1045_v11  ;;  %1058 = vmatprep.subr.bf16.mxu0 %v1057_v47  ;;  %p1124_p12 = pnand %p1123_p11, %p1272_p5 }
  0x17   : > { %s1319_s18 = scalar_lea.vmem %s1449_s0, %s877_s26  ;;  %1050 = vmatprep.subr.bf16.mxu1 %v1049_v19 }
  0x18   : > { %v307_v16 = vld [vmem:[%s1319_s18] sm:$0xff]  ;;  %v308_v17 = vld [vmem:[%s1319_s18 + $0x8] sm:$0xff]  ;;  %v309_v18 = vld [vmem:[%s1319_s18 + $0x10] sm:$0xff]  ;;  %p1125_p13 = pneg %p1124_p12 }
  0x19   : > { %v320_v20 = vsub.f32 %v307_v16, %v878_v14  ;;  %v321_v21 = vsub.f32 %v308_v17, %v878_v14  ;;  %v322_v22 = vsub.f32 %v309_v18, %v878_v14  ;;  %v310_v23 = vld [vmem:[%s1319_s18 + $0x18] sm:$0xff]  ;;  %v311_v24 = vld [vmem:[%s1319_s18 + $0x20] sm:$0xff]  ;;  %v312_v30 = vld [vmem:[%s1319_s18 + $0x28] sm:$0xff] }
  0x1a   : > { %v323_v25 = vsub.f32 %v310_v23, %v878_v14  ;;  %v324_v29 = vsub.f32 %v311_v24, %v878_v14  ;;  %v313_v31 = vld [vmem:[%s1319_s18 + $0x30] sm:$0xff]  ;;  %v325_v33 = vsub.f32 %v312_v30, %v878_v14  ;;  %v314_v36 = vld [vmem:[%s1319_s18 + $0x38] sm:$0xff]  ;;  %1052 = vmatpush3.bf16.msra.mxu1 %v1049_v19  ;;  %v889_v17 = vld [vmem:[%s1454_s5] ss:$0 sm:$0xff]  ;;  %s1126_s18 = sshll.u32 %s1186_s17, 4  ;;  %s1127_s18 = int_to_ptr.vmem [resolvable:$false] %s1126_s18 }
  0x1b   : > { %v333_v26 = vmul.f32 %v879_v15, %v320_v20  ;;  %v334_v27 = vmul.f32 %v879_v15, %v321_v21  ;;  %v335_v28 = vmul.f32 %v879_v15, %v322_v22  ;;  %v326_v35 = vsub.f32 %v313_v31, %v878_v14  ;;  %1054 = vmatprep.subr.bf16.mxu1 %v1053_v43  ;;  %s1128_s20 = scalar_lea.vmem %s1127_s18, 2048  ;;  %p1129_p0 = scmp.lt.s32.totalorder %s1404_s25, %s1127_s18 }
  0x1c   : > { %v336_v32 = vmul.f32 %v879_v15, %v323_v25  ;;  %v337_v34 = vmul.f32 %v879_v15, %v324_v29  ;;  %v338_v37 = vmul.f32 %v879_v15, %v325_v33  ;;  %v327_v38 = vsub.f32 %v314_v36, %v878_v14  ;;  %v649_v14 = vld [vmem:[%s1455_s6 + $0x30] sm:$0xff]  ;;  %p1130_p1 = scmp.lt.s32.totalorder %s1128_s20, %s1122_s13 }
  0x1d   : > { %965 = vmatprep.mubr.msk.f32.mxu0 %vm352_vm0, %v333_v26  ;;  %v339_v39 = vmul.f32 %v879_v15, %v326_v35 }
  0x1e   : > { %966 = vmatmul.mubr.msk.f32.vlgmr.msra.gmra.mrb[0].mxu0 %vm352_vm0, %v334_v27  ;;  %v340_v40 = vmul.f32 %v879_v15, %v327_v38  ;;  %1056 = vmatpush3.bf16.msra.mxu1 %v1053_v43  ;;  %v650_v15 = vld [vmem:[%s1455_s6 + $0x38] sm:$0xff]  ;;  %p1131_p2 = por %p1130_p1, %p1129_p0 }
  0x1f   : > { %968 = vmatprep.mubr.msk.f32.mxu0 %vm352_vm0, %v335_v28  ;;  %1073 = vmatprep.subr.bf16.mxu1 %v1057_v47  ;;  %v1069_v16 = vpack.c.bf16 %v650_v15, %v649_v14 }
  0x20   : > { %1060 = vmatpush3.bf16.msra.mxu0 %v1057_v47  ;;  %p1132_p3 = pnand %p1131_p2, %p1125_p13 }
  0x21   : > { %1062 = vmatprep.subr.bf16.mxu0 %v1061_v49 }
  0x22   : > { %969 = vmatmul.mubr.msk.f32.gmra.mrb[2].mxu0 %vm352_vm0, %v336_v32 }
  0x23   : > { %971 = vmatprep.mubr.msk.f32.mxu0 %vm352_vm0, %v337_v34 }
  0x24   : > { %1064 = vmatpush3.bf16.msra.mxu0 %v1061_v49 }
  0x25   : > { %1066 = vmatprep.subr.bf16.mxu0 %v1065_v52 }
  0x26   : > { %972 = vmatmul.mubr.msk.f32.gmra.mrb[4].mxu0 %vm352_vm0, %v338_v37 }
  0x27   : > { %974 = vmatprep.mubr.msk.f32.mxu0 %vm352_vm0, %v339_v39 }
  0x28   : > { %1068 = vmatpush3.bf16.msra.mxu0 %v1065_v52 }
  0x29   : > { %1070 = vmatprep.subr.bf16.mxu0 %v1069_v16 }
  0x2a   : > { %975 = vmatmul.mubr.msk.f32.gmra.mrb[6].mxu0 %vm352_vm0, %v340_v40 }
  0x2c   : > { %1072 = vmatpush3.bf16.msra.mxu0 %v1069_v16 }
  0xf1   : > { %v967_v54 = vpop.f32.mrb[0].mxu0 }
  0xf2   : > { %v449_v55 = vadd.f32 %v967_v54, %v880_v53  ;;  %v443_v56 = vpop.f32.mrb[1].mxu0 }
  0xf3   : > { %v444_v57 = vadd.f32 %v880_v53, %v443_v56 }
  0xf4   : > { %v483_v60 = vmax.f32 %v449_v55, 0.0 }
  0xf5   : > { %v482_v58 = vmax.f32 %v444_v57, 0.0  ;;  %v970_v59 = vpop.f32.mrb[2].mxu0 }
  0xf6   : > { %v459_v61 = vadd.f32 %v970_v59, %v880_v53  ;;  %v453_v62 = vpop.f32.mrb[3].mxu0 }
  0xf7   : > { %v454_v63 = vadd.f32 %v880_v53, %v453_v62  ;;  %993 = vmatprep.mubr.msk.f32.mxu1 %vm505_vm1, %v482_v58 }
  0xf8   : > { %994 = vmatmul.mubr.msk.f32.vlgmr.msra.gmra.mrb[0].mxu1 %vm505_vm1, %v483_v60  ;;  %v485_v2 = vmax.f32 %v459_v61, 0.0 }
  0xf9   : > { %v484_v0 = vmax.f32 %v454_v63, 0.0  ;;  %v973_v1 = vpop.f32.mrb[4].mxu0  ;;  %1077 = vmatpush3.bf16.msra.mxu1 %v1057_v47 }
  0xfa   : > { %v469_v3 = vadd.f32 %v973_v1, %v880_v53  ;;  %v463_v4 = vpop.f32.mrb[5].mxu0  ;;  %1074 = vmatprep.subr.bf16.mxu1 %v1061_v49 }
  0xfb   : > { %v464_v5 = vadd.f32 %v880_v53, %v463_v4  ;;  %996 = vmatprep.mubr.msk.f32.mxu1 %vm505_vm1, %v484_v0 }
  0xfc   : > { %997 = vmatmul.mubr.msk.f32.gmra.mrb[2].mxu1 %vm505_vm1, %v485_v2  ;;  %v487_v8 = vmax.f32 %v469_v3, 0.0 }
  0xfd   : > { %v486_v6 = vmax.f32 %v464_v5, 0.0  ;;  %v976_v7 = vpop.f32.mrb[6].mxu0  ;;  %1078 = vmatpush3.bf16.msra.mxu1 %v1061_v49 }
  0xfe   : > { %v479_v9 = vadd.f32 %v976_v7, %v880_v53  ;;  %v473_v10 = vpop.f32.mrb[7].mxu0  ;;  %1075 = vmatprep.subr.bf16.mxu1 %v1065_v52 }
  0xff   : > { %v474_v11 = vadd.f32 %v880_v53, %v473_v10  ;;  %999 = vmatprep.mubr.msk.f32.mxu1 %vm505_vm1, %v486_v6 }
 0x100   : > { %1000 = vmatmul.mubr.msk.f32.gmra.mrb[4].mxu1 %vm505_vm1, %v487_v8  ;;  %v489_v13 = vmax.f32 %v479_v9, 0.0 }
 0x101   : > { %v488_v12 = vmax.f32 %v474_v11, 0.0  ;;  %1079 = vmatpush3.bf16.msra.mxu1 %v1065_v52 }
 0x102   : > { %1076 = vmatprep.subr.bf16.mxu1 %v1069_v16 }
 0x103   : > { %1002 = vmatprep.mubr.msk.f32.mxu1 %vm505_vm1, %v488_v12 }
 0x104   : > { %1003 = vmatmul.mubr.msk.f32.gmra.mrb[6].mxu1 %vm505_vm1, %v489_v13 }
 0x105   : > { %1080 = vmatpush3.bf16.msra.mxu1 %v1069_v16 }
 0x1cb   : > { %v995_v18 = vpop.f32.mrb[0].mxu1 }
 0x1cc   : > { %v602_v19 = vadd.f32 %v995_v18, %v889_v17  ;;  %v596_v20 = vpop.f32.mrb[1].mxu1 }
 0x1cd   : > { %v597_v21 = vadd.f32 %v889_v17, %v596_v20 }
 0x1ce   : > { %v636_v24 = vmax.f32 %v602_v19, 0.0 }
 0x1cf   : > { %v635_v22 = vmax.f32 %v597_v21, 0.0  ;;  %v998_v23 = vpop.f32.mrb[2].mxu1 }
 0x1d0   : > { %v612_v25 = vadd.f32 %v998_v23, %v889_v17  ;;  %v606_v26 = vpop.f32.mrb[3].mxu1 }
 0x1d1   : > { %v607_v27 = vadd.f32 %v889_v17, %v606_v26  ;;  %1021 = vmatprep.mubr.msk.f32.mxu0 %vm505_vm1, %v635_v22 }
 0x1d2   : > { %1022 = vmatmul.mubr.msk.f32.vlgmr.msra.gmra.mrb[8].mxu0 %vm505_vm1, %v636_v24  ;;  %v638_v30 = vmax.f32 %v612_v25, 0.0 }
 0x1d3   : > { %v637_v28 = vmax.f32 %v607_v27, 0.0  ;;  %v1001_v29 = vpop.f32.mrb[4].mxu1 }
 0x1d4   : > { %v622_v31 = vadd.f32 %v1001_v29, %v889_v17  ;;  %v616_v32 = vpop.f32.mrb[5].mxu1 }
 0x1d5   : > { %v617_v33 = vadd.f32 %v889_v17, %v616_v32  ;;  %1024 = vmatprep.mubr.msk.f32.mxu0 %vm505_vm1, %v637_v28 }
 0x1d6   : > { %1025 = vmatmul.mubr.msk.f32.gmra.mrb[10].mxu0 %vm505_vm1, %v638_v30  ;;  %v640_v36 = vmax.f32 %v622_v31, 0.0 }
 0x1d7   : > { %v639_v34 = vmax.f32 %v617_v33, 0.0  ;;  %v1004_v35 = vpop.f32.mrb[6].mxu1 }
 0x1d8   : > { %v632_v37 = vadd.f32 %v1004_v35, %v889_v17  ;;  %v626_v38 = vpop.f32.mrb[7].mxu1 }
 0x1d9   : > { %v627_v39 = vadd.f32 %v889_v17, %v626_v38  ;;  %1027 = vmatprep.mubr.msk.f32.mxu0 %vm505_vm1, %v639_v34 }
 0x1da   : > { %1028 = vmatmul.mubr.msk.f32.gmra.mrb[12].mxu0 %vm505_vm1, %v640_v36  ;;  %v642_v41 = vmax.f32 %v632_v37, 0.0 }
 0x1db   : > { %v641_v40 = vmax.f32 %v627_v39, 0.0 }
 0x1dd   : > { %1030 = vmatprep.mubr.msk.f32.mxu1 %vm505_vm1, %v641_v40 }
 0x1de   : > { %1031 = vmatmul.mubr.msk.f32.vlgmr.msra.gmra.mrb[8].mxu1 %vm505_vm1, %v642_v41 }
 0x2a5   : > { %v1023_v43 = vpop.f32.mrb[8].mxu0 }
 0x2a6   : > { %v754_v44 = vadd.f32 %v1023_v43, %v898_v42  ;;  %v748_v45 = vpop.f32.mrb[9].mxu0 }
 0x2a7   : > { %v749_v46 = vadd.f32 %v898_v42, %v748_v45 }
 0x2a8   : > { %788 = vst [vmem:[%s299_s22 + $0x8] sm:$0xff] %v754_v44 }
 0x2a9   : > { %787 = vst [vmem:[%s299_s22] sm:$0xff] %v749_v46  ;;  %v1026_v47 = vpop.f32.mrb[10].mxu0 }
 0x2aa   : > { %v764_v48 = vadd.f32 %v1026_v47, %v898_v42  ;;  %v758_v49 = vpop.f32.mrb[11].mxu0 }
 0x2ab   : > { %v759_v50 = vadd.f32 %v898_v42, %v758_v49 }
 0x2ac   : > { %790 = vst [vmem:[%s299_s22 + $0x18] sm:$0xff] %v764_v48 }
 0x2ad   : > { %789 = vst [vmem:[%s299_s22 + $0x10] sm:$0xff] %v759_v50  ;;  %v1029_v51 = vpop.f32.mrb[12].mxu0 }
 0x2ae   : > { %v774_v52 = vadd.f32 %v1029_v51, %v898_v42  ;;  %v768_v53 = vpop.f32.mrb[13].mxu0 }
 0x2af   : > { %v769_v54 = vadd.f32 %v898_v42, %v768_v53 }
 0x2b0   : > { %792 = vst [vmem:[%s299_s22 + $0x28] sm:$0xff] %v774_v52 }
 0x2b1   : > { %791 = vst [vmem:[%s299_s22 + $0x20] sm:$0xff] %v769_v54  ;;  %v1032_v55 = vpop.f32.mrb[8].mxu1 }
 0x2b2   : > { %v784_v56 = vadd.f32 %v1032_v55, %v898_v42  ;;  %v778_v57 = vpop.f32.mrb[9].mxu1 }
 0x2b3   : > { %v779_v58 = vadd.f32 %v898_v42, %v778_v57 }
 0x2b4   : > { %794 = vst [vmem:[%s299_s22 + $0x38] sm:$0xff] %v784_v56 }
 0x2b5   : > { %793 = vst [vmem:[%s299_s22 + $0x30] sm:$0xff] %v779_v58 }
 0x2b6   : > { %1135 = shalt.err (!%p1132_p3)
}
 0x2b7   : > { %s1136_s19 = scalar_lea.hbm %s1402_s12, 1024  ;;  %s1140_s22 = scalar_lea.hbm %s1457_s8, 2048 }
 0x2b8   : > { %p1137_p4 = scmp.ne.s32.totalorder %s1402_s12, %s1136_s19  ;;  %p1141_p9 = scmp.lt.u32.totalorder %s1402_s12, %s1457_s8 }
 0x2b9   : > { %p1142_p10 = scmp.lt.u32.totalorder %s1140_s22, %s1136_s19  ;;  %p1144_p12 = scmp.lt.u32.totalorder %s1136_s19, %s1402_s12 }
 0x2ba   : > { %p1138_p7 = pnand %p1137_p4, %p1272_p5 }
 0x2bb   : > { %p1143_p11 = por %p1142_p10, %p1141_p9 }
 0x2bc   : > { %p1139_p8 = pneg %p1138_p7 }
 0x2bd   : > { %p1145_p13 = por %p1144_p12, %p1143_p11 }
 0x2bf   : > { %p1146_p0 = pnand %p1145_p13, %p1139_p8 }
 0x2c1   : > { %1149 = shalt.err (!%p1146_p0)
}
 0x2c2   : > { %s1187_s10 = smov 128   ;;  %s1188_s13 = smov 8  }
 0x2c3   : > { %1081 = dma.vmem_to_hbm [thread:$0]  (%p1272_p5), %s1404_s25, 1024, %s1402_s12, %s1408_s9, %s1187_s10, %s1187_s10, %s1188_s13  }
 0x2c4 PF: > { %p1087_p1 = scmp.ge.s32.totalorder %s1184_s30, 2  ;;  %s824_s17 = sand.u32 1, %s1172_s27  }
 0x2c5   : > { %s825_s18 = scalar_lea.sflag [#allocation3], %s824_s17 }
 0x2c6   : > { %p1084_p2 = pnand %p1087_p1, %p1276_p6 }
 0x2c8   : > { %1167 = dma.done.wait (!%p1084_p2), %s825_s18, 1024  }
 0x2c9   : > { %1169 = vsyncadd (!%p1084_p2), %s825_s18, 4294966272  ;;  %p18_p3 = scmp.ge.s32.totalorder %s1259_s11, 4   ;;  %s1460_s27 = smov %s1176_s28 }
 0x2ca   : > { %s1461_s28 = smov %s1180_s29  ;;  %s1462_s29 = smov %s1270_s14 }
 0x2cb   : > { %s1463_s30 = smov %s1259_s11  ;;  %20 = sbr.rel (!%p18_p3) target bundleno = 3 (0x3), region = 87 }
 0x2d2   :  { %830 = vsyncpa [#allocation3], 1 }
 0x2d3   :  { %832 = vsyncpa [#allocation3 + $0x1], 1 }

</bundles_post_ra>
